<compile_context>
chip_gen: v5e
topology: v5e:2x2
jax: 0.10.0
libtpu: 0.0.40
codegen_flags: <defaults>
</compile_context>

<pallas_src>
import functools

import jax
import jax.numpy as jnp
from jax.experimental import pallas as pl
from jax.experimental.pallas import tpu as pltpu

LANE = 128
SUB = 8                         # f32 sublanes; (8, 128) = one f32 vreg
MAX_TILE_ROWS = 2048            # 2048*128*4B = 1 MiB per f32 input per block
VMEM_LIMIT_BYTES = 32 * 1024 * 1024


def _focal_loss_kernel(pred_ref, true_ref, out_ref, *,
                       gamma, alpha, rows, tile_rows):
    """One grid step: focal loss on a (tile_rows, 128) block, folded to an
    (8, 128) lane-dense partial-sum slab (VPU-only reduce)."""
    i = pl.program_id(0)

    x = pred_ref[...].astype(jnp.float32)   # logits (cast in-kernel)
    z = true_ref[...].astype(jnp.float32)   # targets

    # Shared e = exp(-|x|) feeds both the stable BCE log term and the sigmoid.
    ax = jnp.abs(x)
    e = jnp.exp(-ax)
    # BCEWithLogits (reduction='none'): max(x,0) - x*z + log(1 + exp(-|x|))
    bce = jnp.maximum(x, 0.0) - x * z + jnp.log1p(e)

    # sigmoid(x) = where(x>=0, 1, e) / (1 + e); approx reciprocal + one
    # Newton-Raphson step (VPU) restores full f32 accuracy cheaply.
    d = 1.0 + e
    inv = pl.reciprocal(d, approx=True)
    inv = inv * (2.0 - d * inv)
    sig = jnp.where(x >= 0.0, 1.0, e) * inv

    # Algebraic trims (fewer VALU ops than the naive p_t / alpha_factor forms):
    #   t  = 1 - p_t      = sig + z - 2*z*sig
    #   af = alpha factor = (1-alpha) + z*(2*alpha - 1)
    t = sig + z - 2.0 * (z * sig)
    t = jnp.maximum(t, 0.0)                 # guard sqrt against ulp negatives
    af = (1.0 - alpha) + z * (2.0 * alpha - 1.0)

    if gamma == 1.5:
        mf = t * jnp.sqrt(t)
    elif gamma == 2.0:
        mf = t * t
    elif gamma == 1.0:
        mf = t
    elif gamma == 0.0:
        mf = None
    else:
        mf = t ** gamma                     # generic exp+log path (non-production gammas)

    loss = bce * af
    if mf is not None:
        loss = loss * mf

    def fold(v):
        # VPU-only fold of block rows into one lane-dense (8,128) slab.
        return v.reshape(tile_rows // SUB, SUB, LANE).sum(axis=0)

    if rows % tile_rows == 0:
        # Every block is full: no mask code in the kernel at all.
        out_ref[...] = fold(loss)
    else:
        # Only the single partial last block pays for mask generation.
        last = pl.num_programs(0) - 1

        @pl.when(i != last)
        def _():
            out_ref[...] = fold(loss)

        @pl.when(i == last)
        def _():
            # Row-indexed mask (kernel only ever sees full 128-lane rows),
            # so no element-index int32 overflow for huge inputs.
            row_ids = jax.lax.broadcasted_iota(jnp.int32, (tile_rows, LANE), 0)
            valid = (i * tile_rows + row_ids) < rows
            out_ref[...] = fold(jnp.where(valid, loss, 0.0))


def _focal_elementwise_jax(x, z, gamma, alpha):
    """Plain-JAX elementwise focal loss (used only for the tiny unaligned tail)."""
    x = x.astype(jnp.float32)
    z = z.astype(jnp.float32)
    bce = jnp.maximum(x, 0.0) - x * z + jnp.log1p(jnp.exp(-jnp.abs(x)))
    sig = jax.nn.sigmoid(x)
    p_t = z * sig + (1.0 - z) * (1.0 - sig)
    af = z * alpha + (1.0 - z) * (1.0 - alpha)
    mf = (1.0 - p_t) ** gamma
    return bce * af * mf


def focal_loss(pred, true, gamma=1.5, alpha=0.25, reduction="mean"):
    """Focal loss wrapping BCE-with-logits; elementwise + partial reduce in Pallas."""
    assert pred.shape == true.shape
    total = pred.size

    if reduction not in ("mean", "sum"):
        # TODO(synk): 'none' reduction (elementwise slab output) is not wired
        # up in this reduced-output kernel.
        raise NotImplementedError("reduction='none' not supported in this kernel")

    # dtype-aware packing granularity: 8 sublanes f32, 16 bf16, 32 int8/fp8.
    itemsize = min(jnp.dtype(pred.dtype).itemsize, jnp.dtype(true.dtype).itemsize)
    grain = SUB * max(1, 4 // max(1, int(itemsize)))
    chunk = grain * LANE

    rows = (total // chunk) * grain          # kernel rows (multiple of grain)
    main = rows * LANE
    tail = total - main                      # < chunk elements

    pred_flat = pred.reshape(-1)
    true_flat = true.reshape(-1)

    total_sum = jnp.float32(0.0)

    if rows > 0:
        # When total is chunk-aligned this reshape is a free bitcast (no pad,
        # no copy).
        # TODO(synk): for unaligned totals the prefix slice may still
        # materialize a copy in XLA; a raw-HBM (pl.ANY) + manual-DMA path
        # would remove it entirely.
        pred2d = pred_flat[:main].reshape(rows, LANE)
        true2d = true_flat[:main].reshape(rows, LANE)

        # Tile selection: multiple of `grain`, capped by MAX_TILE_ROWS, and
        # >= 2 blocks whenever possible so the 'parallel' axis can span both
        # v7x TensorCores.
        if rows < 2 * grain:
            tile_rows = rows
        else:
            half = -(-rows // 2)                     # ceil(rows / 2)
            half = -(-half // grain) * grain         # round up to grain
            tile_rows = min(MAX_TILE_ROWS, half)
        num_blocks = -(-rows // tile_rows)

        in_spec = pl.BlockSpec((tile_rows, LANE), lambda i: (i, 0))

        partials = pl.pallas_call(
            functools.partial(_focal_loss_kernel, gamma=gamma, alpha=alpha,
                              rows=rows, tile_rows=tile_rows),
            out_shape=jax.ShapeDtypeStruct((num_blocks * SUB, LANE), jnp.float32),
            grid=(num_blocks,),
            in_specs=[in_spec, in_spec],
            out_specs=pl.BlockSpec((SUB, LANE), lambda i: (i, 0)),
            compiler_params=pltpu.CompilerParams(
                dimension_semantics=("parallel",),
                vmem_limit_bytes=VMEM_LIMIT_BYTES),
        )(pred2d, true2d)

        total_sum = total_sum + jnp.sum(partials, dtype=jnp.float32)

    if tail > 0:
        # Sub-chunk tail: plain JAX, negligible, replaces the old full-array
        # pad copy.
        total_sum = total_sum + jnp.sum(
            _focal_elementwise_jax(pred_flat[main:], true_flat[main:],
                                   gamma, alpha),
            dtype=jnp.float32)

    if reduction == "mean":
        return total_sum / jnp.float32(total)
    return total_sum


def _focal_loss_ref(pred, true, gamma=1.5, alpha=0.25):
    return jnp.mean(_focal_elementwise_jax(pred, true, gamma, alpha))


if __name__ == "__main__":
    key = jax.random.PRNGKey(0)
    k1, k2 = jax.random.split(key)
    # Small NCHW-like shapes, consistent with YOLO-style objectness logits.
    pred = jax.random.normal(k1, (2, 4, 16, 16), dtype=jnp.float32) * 2.0
    true = (jax.random.uniform(k2, (2, 4, 16, 16)) > 0.7).astype(jnp.float32)

    out = focal_loss(pred, true, gamma=1.5, alpha=0.25, reduction="mean")
    out = jax.block_until_ready(out)

    ref = _focal_loss_ref(pred, true)
    assert jnp.allclose(out, ref, rtol=1e-4, atol=1e-6), (out, ref)
    print("KERNEL_OK")
</pallas_src>

<mosaic_0001>
module attributes {stable_mosaic.version = 11 : i64} {
  func.func @_focal_loss_kernel(%arg0: i32, %arg1: memref<8x128xf32, #tpu.memory_space<vmem>>, %arg2: memref<8x128xf32, #tpu.memory_space<vmem>>, %arg3: memref<8x128xf32, #tpu.memory_space<vmem>>) attributes {dimension_semantics = [#tpu.dimension_semantics<parallel>], iteration_bounds = array<i64: 2>, scalar_prefetch = 0 : i64, scratch_operands = 0 : i64, tpu.core_type = #tpu.core_type<tc>, window_params = [{transform_indices = @transform_0, window_bounds = array<i64: 8, 128>}, {transform_indices = @transform_1, window_bounds = array<i64: 8, 128>}, {transform_indices = @transform_2, window_bounds = array<i64: 8, 128>}]} {
    %c0 = arith.constant 0 : index
    %c0_0 = arith.constant 0 : index
    %0 = vector.load %arg1[%c0, %c0_0] : memref<8x128xf32, #tpu.memory_space<vmem>>, vector<8x128xf32>
    %c0_1 = arith.constant 0 : index
    %c0_2 = arith.constant 0 : index
    %1 = vector.load %arg2[%c0_1, %c0_2] : memref<8x128xf32, #tpu.memory_space<vmem>>, vector<8x128xf32>
    %2 = math.absf %0 : vector<8x128xf32>
    %cst = arith.constant 0.000000e+00 : f32
    %3 = vector.broadcast %cst : f32 to vector<8x128xf32>
    %4 = arith.subf %3, %2 : vector<8x128xf32>
    %5 = math.exp %4 : vector<8x128xf32>
    %cst_3 = arith.constant 0.000000e+00 : f32
    %6 = vector.broadcast %cst_3 : f32 to vector<8x128xf32>
    %7 = arith.maximumf %0, %6 : vector<8x128xf32>
    %8 = arith.mulf %0, %1 : vector<8x128xf32>
    %9 = arith.subf %7, %8 : vector<8x128xf32>
    %10 = math.log1p %5 : vector<8x128xf32>
    %11 = arith.addf %9, %10 : vector<8x128xf32>
    %cst_4 = arith.constant 1.000000e+00 : f32
    %12 = vector.broadcast %cst_4 : f32 to vector<8x128xf32>
    %13 = arith.addf %12, %5 : vector<8x128xf32>
    %14 = tpu.reciprocal %13 {approx = true} : vector<8x128xf32> -> vector<8x128xf32>
    %15 = arith.mulf %13, %14 : vector<8x128xf32>
    %cst_5 = arith.constant 2.000000e+00 : f32
    %16 = vector.broadcast %cst_5 : f32 to vector<8x128xf32>
    %17 = arith.subf %16, %15 : vector<8x128xf32>
    %18 = arith.mulf %14, %17 : vector<8x128xf32>
    %cst_6 = arith.constant 0.000000e+00 : f32
    %19 = vector.broadcast %cst_6 : f32 to vector<8x128xf32>
    %20 = arith.cmpf oge, %0, %19 : vector<8x128xf32>
    %cst_7 = arith.constant 1.000000e+00 : f32
    %21 = vector.broadcast %cst_7 : f32 to vector<8x128xf32>
    %22 = arith.select %20, %21, %5 : vector<8x128xi1>, vector<8x128xf32>
    %23 = arith.mulf %22, %18 : vector<8x128xf32>
    %24 = arith.addf %23, %1 : vector<8x128xf32>
    %25 = arith.mulf %1, %23 : vector<8x128xf32>
    %cst_8 = arith.constant 2.000000e+00 : f32
    %26 = vector.broadcast %cst_8 : f32 to vector<8x128xf32>
    %27 = arith.mulf %26, %25 : vector<8x128xf32>
    %28 = arith.subf %24, %27 : vector<8x128xf32>
    %cst_9 = arith.constant 0.000000e+00 : f32
    %29 = vector.broadcast %cst_9 : f32 to vector<8x128xf32>
    %30 = arith.maximumf %28, %29 : vector<8x128xf32>
    %cst_10 = arith.constant -5.000000e-01 : f32
    %31 = vector.broadcast %cst_10 : f32 to vector<8x128xf32>
    %32 = arith.mulf %1, %31 : vector<8x128xf32>
    %cst_11 = arith.constant 7.500000e-01 : f32
    %33 = vector.broadcast %cst_11 : f32 to vector<8x128xf32>
    %34 = arith.addf %33, %32 : vector<8x128xf32>
    %35 = math.sqrt %30 : vector<8x128xf32>
    %36 = arith.mulf %30, %35 : vector<8x128xf32>
    %37 = arith.mulf %11, %34 : vector<8x128xf32>
    %38 = arith.mulf %37, %36 : vector<8x128xf32>
    %39 = vector.shape_cast %38 : vector<8x128xf32> to vector<1x8x128xf32>
    %cst_12 = arith.constant dense<0.000000e+00> : vector<8x128xf32>
    %40 = vector.multi_reduction <add>, %39, %cst_12 [0] : vector<1x8x128xf32> to vector<8x128xf32>
    %c0_13 = arith.constant 0 : index
    %c0_14 = arith.constant 0 : index
    %41 = vector.load %arg3[%c0_13, %c0_14] : memref<8x128xf32, #tpu.memory_space<vmem>>, vector<8x128xf32>
    tpu.vector_store %arg3[%c0_13, %c0_14], %40 {strides = array<i32>} : memref<8x128xf32, #tpu.memory_space<vmem>>, vector<8x128xf32>,
    return
  }
  func.func @transform_0(%arg0: i32) -> (i32, i32) {
    %c0_i32 = arith.constant 0 : i32
    %c0_i32_0 = arith.constant 0 : i32
    return %arg0, %c0_i32 : i32, i32
  }
  func.func @transform_1(%arg0: i32) -> (i32, i32) {
    %c0_i32 = arith.constant 0 : i32
    %c0_i32_0 = arith.constant 0 : i32
    return %arg0, %c0_i32 : i32, i32
  }
  func.func @transform_2(%arg0: i32) -> (i32, i32) {
    %c0_i32 = arith.constant 0 : i32
    %c0_i32_0 = arith.constant 0 : i32
    return %arg0, %c0_i32 : i32, i32
  }
}

</mosaic_0001>

<bundles_post_ra>
// kernel: tpu_custom_call.1
= control target key start
LH: loop header
LB: loop body
LE: loop exit
PB: predicated region body
PF: predicated region fallthrough
CT: control target
= control target key end

     0   :  { %7 = vsyncpa [#allocation3], 0  ;;  %s746_s0 = inlined_call_operand.hbm [shape: f32[16,128], index: 0, kind: input, shape index: {}]   ;;  %s747_s1 = inlined_call_operand.hbm [shape: f32[16,128], index: 1, kind: input, shape index: {}]   ;;  %s748_s2 = inlined_call_operand.hbm [shape: f32[16,128], index: 2, kind: output, shape index: {}]  }
   0x1   :  { %9 = vsyncpa [#allocation3 + $0x1], 0 }
   0x2   :  { %10 = vsyncpa [#allocation6], 0 }
   0x3   :  { %12 = vsyncpa [#allocation6 + $0x1], 0 }
   0x4   :  { %13 = vsyncpa [#allocation4], 0 }
   0x5   :  { %15 = vsyncpa [#allocation4 + $0x1], 0  ;;  %s581_s9 = smov 0   ;;  %s583_s10 = smov 0  }
   0x6   :  { %s585_s11 = smov 0   ;;  %s587_s12 = smov 0  }
   0x7 LB: > { %s602_s13 = sadd.s32 4294967295, %s564_s12   ;;  %s360_s14 = sadd.s32 4294967294, %s564_s12   ;;  %s564_s12 = sphi %s587_s12, %s759_s12   ;;  %s560_s11 = sphi %s585_s11, %s758_s11   ;;  %s556_s10 = sphi %s583_s10, %s757_s10   ;;  %s552_s9 = sphi %s581_s9, %s756_s9  }
   0x8   : > { %s606_s15 = sadd.s32 1, %s564_s12   ;;  %s28_s16 = sadd.s32 1, %s560_s11 }
   0x9   : > { %s25_s17 = ssub.s32 %s564_s12, %s606_s15  ;;  %p35_p0 = scmp.ne.s32.totalorder %s560_s11, %s556_s10 }
   0xa   : > { %p26_p1 = scmp.eq.s32.totalorder %s25_s17, 0  ;;  %p36_p2 = scmp.eq.s32.totalorder %s564_s12, 0 }
   0xb   : > { %p41_p3 = scmp.ne.s32.totalorder %s556_s10, %s552_s9  ;;  %p42_p4 = scmp.eq.s32.totalorder %s602_s13, 0 }
   0xc   : > { %s618_s18 = scalar_select %p26_p1, %s560_s11, %s28_s16  }
   0xd   : > { %p620_p5 = por %p36_p2, %p35_p0  ;;  %p624_p6 = por %p42_p4, %p41_p3 }
   0xe   : > { %p91_p7 = scmp.eq.s32.totalorder %s602_s13, 1  ;;  %p97_p8 = scmp.eq.s32.totalorder %s360_s14, 1 }
   0xf   : > { %p392_p10 = scmp.lt.s32.totalorder %s564_s12, 2  ;;  %s640_s23 = sand.u32 1, %s560_s11  }
  0x10   : > { %p631_p11 = por %p91_p7, %p35_p0  ;;  %p635_p12 = por %p97_p8, %p41_p3 }
  0x11   : > { %s364_s24 = sshll.u32 %s564_s12, 3  ;;  %s363_s25 = sshll.u32 %s640_s23, 3 }
  0x12   : > { %s125_s28 = scalar_lea.hbm %s746_s0, %s364_s24  ;;  %s121_s30 = scalar_lea.vmem [#allocation2], %s363_s25 }
  0x13   : > { %s127_s29 = sshll.u32 %s125_s28, 4  ;;  %s129_s3 = sshll.u32 %s121_s30, 4  ;;  %s128_s29 = int_to_ptr.hbm [resolvable:$true] %s127_s29  ;;  %s130_s3 = int_to_ptr.vmem [resolvable:$true] %s129_s3 }
  0x14   : > { %p649_p13 = pnand %p392_p10, %p620_p5  ;;  %p367_p0 = scmp.ge.s32.totalorder %s564_s12, 1 }
  0x15   : > { %p153_p1 = scmp.lt.s32.totalorder %s564_s12, 3  ;;  %s118_s5 = scalar_lea.sflag [#allocation3], %s640_s23 }
  0x16   : > { %s434_s6 = sshra.s32 %s128_s29, 4  ;;  %p438_p3 = pneg %p649_p13  ;;  %s435_s6 = int_to_ptr.hbm [resolvable:$true] %s434_s6 }
  0x17   : > { %s436_s7 = scalar_lea.hbm %s435_s6, 8  ;;  %s441_s16 = scalar_lea.hbm %s746_s0, 16 }
  0x18   : > { %p437_p2 = scmp.ne.s32.totalorder %s435_s6, %s436_s7  ;;  %p442_p5 = scmp.lt.s32.totalorder %s435_s6, %s746_s0 }
  0x19   : > { %p443_p8 = scmp.lt.s32.totalorder %s441_s16, %s436_s7 }
  0x1a   : > { %p439_p4 = pnand %p438_p3, %p437_p2 }
  0x1b   : > { %p444_p10 = por %p443_p8, %p442_p5 }
  0x1c   : > { %p440_p7 = pneg %p439_p4 }
  0x1e   : > { %p445_p9 = pnand %p444_p10, %p440_p7 }
  0x20   : > { %448 = shalt.err (!%p445_p9)
}
  0x21   : > { %384 = dma.hbm_to_vmem [thread:$0]  (!%p649_p13), %s128_s29, 128, %s130_s3, %s118_s5  }
  0x22   : > { %p673_p2 = pnand %p367_p0, %p153_p1  ;;  %s144_s30 = scalar_lea.hbm %s747_s1, %s364_s24 }
  0x23   : > { %s146_s6 = sshll.u32 %s144_s30, 4  ;;  %s140_s7 = scalar_lea.vmem [#allocation5], %s363_s25  ;;  %s147_s6 = int_to_ptr.hbm [resolvable:$true] %s146_s6 }
  0x24   : > { %s148_s8 = sshll.u32 %s140_s7, 4  ;;  %s137_s14 = scalar_lea.sflag [#allocation6], %s640_s23  ;;  %s149_s8 = int_to_ptr.vmem [resolvable:$true] %s148_s8 }
  0x25   : > { %s464_s16 = sshra.s32 %s147_s6, 4  ;;  %s471_s5 = scalar_lea.hbm %s747_s1, 16  ;;  %s465_s16 = int_to_ptr.hbm [resolvable:$true] %s464_s16 }
  0x26   : > { %s466_s17 = scalar_lea.hbm %s465_s16, 8  ;;  %p472_p4 = scmp.lt.s32.totalorder %s465_s16, %s747_s1 }
  0x27   : > { %p467_p9 = scmp.ne.s32.totalorder %s465_s16, %s466_s17  ;;  %p473_p7 = scmp.lt.s32.totalorder %s471_s5, %s466_s17 }
  0x29   : > { %p469_p0 = pnand %p467_p9, %p438_p3  ;;  %p474_p5 = por %p473_p7, %p472_p4 }
  0x2b   : > { %p470_p1 = pneg %p469_p0 }
  0x2d   : > { %p475_p8 = pnand %p474_p5, %p470_p1 }
  0x2f   : > { %478 = shalt.err (!%p475_p8)
}
  0x30   : > { %387 = dma.hbm_to_vmem [thread:$0]  (!%p649_p13), %s147_s6, 128, %s149_s8, %s137_s14  }
  0x31   : > { %157 = sbr.rel (%p673_p2) target bundleno = 124 (0x7c), region = 28  ;;  %s695_s23 = sand.u32 (!%p673_p2), 1, %s556_s10  }
  0x32   : > { %s698_s25 = sshll.u32 (!%p673_p2), %s695_s23, 3  ;;  %s160_s27 = scalar_lea.sflag (!%p673_p2), [#allocation3], %s695_s23 }
  0x33   : > { %s163_s28 = scalar_lea.vmem (!%p673_p2), [#allocation2], %s698_s25 }
  0x36   : > { %539 = dma.done.wait (%p624_p6), %s160_s27, 128  }
  0x37   : > { %541 = vsyncadd (%p624_p6), %s160_s27, 4294967168  ;;  %s170_s4 = scalar_lea.sflag [#allocation6], %s695_s23  ;;  %s173_s26 = scalar_lea.vmem [#allocation5], %s698_s25 }
  0x38   : > { %543 = dma.done.wait (%p624_p6), %s170_s4, 128  }
  0x39   : > { %545 = vsyncadd (%p624_p6), %s170_s4, 4294967168  ;;  %v200_v0 = vld [vmem:[%s163_s28] sm:$0xff]  ;;  %v201_v11 = vld [vmem:[%s173_s26] sm:$0xff]  ;;  %s372_s20 = sshll.u32 %s602_s13, 3  ;;  %s199_s8 = scalar_lea.vmem [#allocation7], %s698_s25 }
  0x3a   : > { %v202_v1 = vand.u32 2147483647, %v200_v0  ;;  %vm224_vm0 = vcmp.ge.f32.partialorder %v200_v0, 0.0  ;;  %v206_v23 = vmax.f32 %v200_v0, 0.0  ;;  %v207_v24 = vmul.f32 %v201_v11, %v200_v0  ;;  %s262_s7 = scalar_lea.hbm %s748_s2, %s372_s20  ;;  %s264_s14 = sshll.u32 %s199_s8, 4  ;;  %s265_s14 = int_to_ptr.vmem [resolvable:$true] %s264_s14 }
  0x3b   : > { %v232_v30 = vmul.f32 -0.5, %v201_v11  ;;  %s266_s16 = sshll.u32 %s262_s7, 4  ;;  %s252_s13 = scalar_lea.sflag [#allocation4], %s695_s23  ;;  %s267_s16 = int_to_ptr.hbm [resolvable:$true] %s266_s16 }
  0x3c   : > { %v203_v2 = vsub.f32 0.0, %v202_v1  ;;  %v208_v29 = vsub.f32 %v206_v23, %v207_v24  ;;  %s508_s17 = sshra.s32 %s267_s16, 4  ;;  %s514_s19 = scalar_lea.hbm %s748_s2, 16  ;;  %s509_s17 = int_to_ptr.hbm [resolvable:$true] %s508_s17 }
  0x3d   : > { %v233_v35 = vadd.f32 0.75, %v232_v30  ;;  %s510_s29 = scalar_lea.hbm %s509_s17, 8  ;;  %p515_p10 = scmp.lt.s32.totalorder %s509_s17, %s748_s2 }
  0x3e   : > { %v204_v3 = vmul.f32 1.442695, %v203_v2  ;;  %p511_p6 = scmp.ne.s32.totalorder %s509_s17, %s510_s29  ;;  %p516_p2 = scmp.lt.s32.totalorder %s514_s19, %s510_s29 }
  0x40   : > { %426 = vpow2.f32 %v204_v3  ;;  %p512_p13 = pnand %p511_p6, %p631_p11  ;;  %p517_p9 = por %p516_p2, %p515_p10 }
  0x42   : > { %p513_p3 = pneg %p512_p13 }
  0x44   : > { %p518_p0 = pnand %p517_p9, %p513_p3 }
  0x46   : > { %v427_v4 = vpop.eup %426 }
  0x47   : > { %v209_v5 = vadd.f32 1.0, %v427_v4  ;;  %v225_v9 = vsel %vm224_vm0, 1.0, %v427_v4  ;;  %v212_v18 = vmul.f32 -0.5, %v427_v4  ;;  %v215_v21 = vand.u32 2147483647, %v427_v4 }
  0x49   : > { %428 = vrcp.f32 %v209_v5  ;;  %v213_v19 = vadd.f32 1.0, %v212_v18  ;;  %vm216_vm1 = vcmp.lt.f32.partialorder %v215_v21, 0.0004427343 }
  0x4a   : > { %430 = vlog2.f32 %v209_v5 }
  0x4b   : > { %v214_v27 = vmul.f32 %v427_v4, %v213_v19 }
  0x4f   : > { %v429_v6 = vpop.eup %428 }
  0x50   : > { %v221_v7 = vmul.f32 %v429_v6, %v209_v5  ;;  %v431_v20 = vpop.eup %430 }
  0x51   : > { %v211_v26 = vmul.f32 0.6931472, %v431_v20 }
  0x52   : > { %v222_v8 = vsub.f32 2.0, %v221_v7 }
  0x53   : > { %v217_v32 = vsel %vm216_vm1, %v214_v27, %v211_v26 }
  0x54   : > { %v223_v10 = vmul.f32 %v429_v6, %v222_v8  ;;  %v218_v34 = vadd.f32 %v217_v32, %v208_v29 }
  0x56   : > { %v226_v12 = vmul.f32 %v225_v9, %v223_v10  ;;  %v247_v40 = vmul.f32 %v233_v35, %v218_v34 }
  0x58   : > { %v227_v13 = vadd.f32 %v226_v12, %v201_v11  ;;  %v228_v14 = vmul.f32 %v226_v12, %v201_v11 }
  0x5a   : > { %v229_v15 = vmul.f32 2.0, %v228_v14 }
  0x5c   : > { %v230_v16 = vsub.f32 %v227_v13, %v229_v15 }
  0x5e   : > { %v231_v17 = vmax.f32 %v230_v16, 0.0 }
  0x60   : > { %432 = vrsqrt.f32 %v231_v17  ;;  %vm241_vm2 = vcmp.eq.f32.partialorder %v231_v17, inf  ;;  %v244_v37 = vand.u32 2147483648, %v231_v17  ;;  %vm243_vm3 = vcmp.eq.f32.partialorder %v231_v17, 0.0 }
  0x66   : > { %v433_v22 = vpop.eup %432 }
  0x67   : > { %v235_v25 = vmul.f32 %v433_v22, %v231_v17 }
  0x69   : > { %v236_v28 = vmul.f32 %v433_v22, %v235_v25 }
  0x6b   : > { %v237_v31 = vmul.f32 0.5, %v236_v28 }
  0x6d   : > { %v238_v33 = vsub.f32 1.5, %v237_v31 }
  0x6f   : > { %v239_v36 = vmul.f32 %v433_v22, %v238_v33 }
  0x71   : > { %v240_v38 = vmul.f32 %v239_v36, %v231_v17 }
  0x73   : > { %v242_v39 = vsel %vm241_vm2, %v231_v17, %v240_v38 }
  0x74   : > { %v245_v41 = vsel %vm243_vm3, %v244_v37, %v242_v39 }
  0x75   : > { %v246_v42 = vmul.f32 %v245_v41, %v231_v17 }
  0x77   : > { %v248_v43 = vmul.f32 %v247_v40, %v246_v42 }
  0x79   : > { %250 = vst [vmem:[%s199_s8] sm:$0xff] %v248_v43 }
  0x7a   : > { %521 = shalt.err (!%p518_p0)
}
  0x7b   : > { %379 = dma.vmem_to_hbm [thread:$0]  (%p631_p11), %s265_s14, 128, %s267_s16, %s252_s13  }
  0x7c PF: > { %s278_s23 = sand.u32 1, %s552_s9   ;;  %p755_p1 = scmp.ge.s32.totalorder %s564_s12, 2 }
  0x7d   : > { %s279_s27 = scalar_lea.sflag [#allocation4], %s278_s23 }
  0x7e   : > { %p389_p4 = pnand %p755_p1, %p635_p12 }
  0x80   : > { %p390_p7 = pneg %p389_p4 }
  0x82   : > { %547 = dma.done.wait (%p390_p7), %s279_s27, 128  }
  0x83   : > { %549 = vsyncadd (%p390_p7), %s279_s27, 4294967168  ;;  %p18_p5 = scmp.ge.s32.totalorder %s606_s15, 4   ;;  %s756_s9 = smov %s556_s10 }
  0x84   : > { %s757_s10 = smov %s560_s11  ;;  %s758_s11 = smov %s618_s18 }
  0x85   : > { %s759_s12 = smov %s606_s15  ;;  %20 = sbr.rel (!%p18_p5) target bundleno = 7 (0x7), region = 86 }
  0x8a   :  { %285 = vsyncpa [#allocation3], 1 }
  0x8b   :  { %287 = vsyncpa [#allocation3 + $0x1], 1 }
  0x8c   :  { %288 = vsyncpa [#allocation6], 1 }
  0x8d   :  { %290 = vsyncpa [#allocation6 + $0x1], 1 }
  0x8e   :  { %291 = vsyncpa [#allocation4], 1 }
  0x8f   :  { %293 = vsyncpa [#allocation4 + $0x1], 1 }

</bundles_post_ra>
